<compile_context>
chip_gen: v5e
topology: v5e:2x2
jax: 0.10.0
libtpu: 0.0.40
codegen_flags: <defaults>
</compile_context>

<pallas_src>
import functools

import jax
import jax.numpy as jnp
from jax.experimental import pallas as pl
from jax.experimental.pallas import tpu as pltpu


def _round_up(n, m):
    return -(-n // m) * m


def _cdiv(a, b):
    return -(-a // b)


def _physical_vmem_bytes():
    """Best-effort per-TensorCore VMEM capacity (conservative on unknowns)."""
    by_kind = 64 * 1024 * 1024            # v7x-safe default
    try:
        kind = jax.devices()[0].device_kind.lower()
        if any(tag in kind for tag in ("v4", "v5", "v6")):
            by_kind = 128 * 1024 * 1024
    except Exception:
        pass
    try:
        info_cap = int(getattr(pltpu.get_tpu_info(), "vmem_capacity_bytes", 0))
        if info_cap > 0:
            return min(by_kind, info_cap)
    except Exception:
        pass
    return by_kind


def _tile_plan(batch, seq, hdim, x_itemsize, out_itemsize, budget):
    """Pick (batch_tile, len_tile) so the per-step VMEM working set fits budget.

    Working-set model per grid step:
      * double-buffered pipeline buffers: x (tb, tl, H), mask (tb, tl, 1) i32,
        out (tb, H), weight (tiny)
      * persistent scratch: m/l (tb, 1) f32 (lane padded) + acc (tb, H) f32
      * in-kernel f32 temporaries (widened x + elementwise product): ~2 tiles
    """
    h_lanes = _round_up(hdim, 128)
    w_bytes = 2 * h_lanes * 4
    # per batch-row bytes that do not scale with the chunk length
    fixed_row = 2 * h_lanes * out_itemsize + 2 * 128 * 4 + h_lanes * 4
    # per (batch-row, position) bytes inside one chunk
    per_pos = 2 * hdim * x_itemsize + 2 * 4 + 2 * hdim * 4

    def working_set(tb, tl):
        return tb * (fixed_row + tl * per_pos) + w_bytes

    # ---- batch tile (full-length chunks preferred) -----------------------
    if batch <= 8:
        tb = batch
    else:
        fit = (budget - w_bytes) // max(fixed_row + seq * per_pos, 1)
        tb = min((batch // 8) * 8, max(8, (fit // 8) * 8))
        nb = _cdiv(batch, tb)
        if nb == 1 or (1 < nb < 8 and nb % 2 == 1):
            # keep >= 2 (preferably an even number of) batch steps so both
            # TensorCores get balanced work under "parallel" semantics.
            tb = min(tb, max(8, _round_up(_cdiv(batch, max(2, nb + 1)), 8)))

    # ---- length tile (only when a minimal batch tile still busts VMEM) ---
    tl = seq
    if working_set(tb, tl) > budget:
        fit_pos = (budget - w_bytes) // max(tb, 1) - fixed_row
        tl = min(seq, max(8, ((fit_pos // max(per_pos, 1)) // 8) * 8))
    return tb, tl, working_set(tb, tl)


def _pool_kernel(w_ref, x_ref, mask_ref, out_ref, m_ref, l_ref, acc_ref,
                 *, l_chunk, seq_len, ragged_l, score_via_mxu):
    li = pl.program_id(1)

    @pl.when(li == 0)
    def _():
        m_ref[...] = jnp.full(m_ref.shape, -jnp.inf, dtype=m_ref.dtype)
        l_ref[...] = jnp.zeros(l_ref.shape, dtype=l_ref.dtype)
        acc_ref[...] = jnp.zeros(acc_ref.shape, dtype=acc_ref.dtype)

    x = x_ref[...].astype(jnp.float32)                    # (tb, tl, H), f32 on-chip
    tb, tl, hdim = x.shape
    pad = mask_ref[...] != 0                              # (tb, tl, 1)

    if ragged_l:
        # Ragged length tail: undefined OOB data must not leak into the sums.
        pos = li * l_chunk + jax.lax.broadcasted_iota(jnp.int32, (tb, tl, 1), 1)
        oob = pos >= seq_len
        x = jnp.where(oob, 0.0, x)
        pad = jnp.logical_or(pad, oob)

    neg_inf = jnp.float32(-jnp.inf)
    if score_via_mxu:
        # H on lanes for both operands: ~1 vmatmul per x vreg, no relayout
        # (reshape merges leading dims only; tl is a multiple of 8).
        scores = jnp.dot(
            x.reshape(tb * tl, hdim), w_ref[...].astype(jnp.float32),
            preferred_element_type=jnp.float32).reshape(tb, tl, 1)
    else:
        w = w_ref[...].astype(jnp.float32)                # (1, H)
        scores = jnp.sum(x * w[None, :, :], axis=-1, keepdims=True)
    scores = jnp.where(pad, neg_inf, scores)              # (tb, tl, 1)

    # ---- online softmax over the length axis ------------------------------
    m_prev = m_ref[...]                                   # (tb, 1)
    m_new = jnp.maximum(m_prev, jnp.max(scores, axis=1))  # (tb, 1)
    # Guard -inf - -inf -> NaN while no valid position has been seen yet.
    # Rows that stay fully masked keep l == 0 and finalize to NaN (== torch).
    m_safe = jnp.where(m_new == neg_inf, 0.0, m_new)
    p = jnp.exp(scores - m_safe[:, None, :])              # (tb, tl, 1)
    corr = jnp.exp(m_prev - m_safe)                       # (tb, 1)

    l_ref[...] = corr * l_ref[...] + jnp.sum(p, axis=1)
    acc_ref[...] = corr * acc_ref[...] + jnp.sum(p * x, axis=1)
    m_ref[...] = m_new

    @pl.when(li == pl.num_programs(1) - 1)
    def _():
        out_ref[...] = (acc_ref[...] *
                        pl.reciprocal(l_ref[...], approx=False)).astype(out_ref.dtype)


@jax.jit
def linear_seq_attn_pooling(x, weight, x_mask=None):
    """x: (B, L, H); weight: (1, H) = nn.Linear(H, 1, bias=False).weight;
    x_mask: (B, L) with nonzero == padding, or None.
    Returns (B, H) = softmax_L(x @ W^T, masked) used as weights over x."""
    batch, seq, hdim = x.shape
    if x_mask is None:
        x_mask = jnp.zeros((batch, seq), dtype=jnp.int32)
    mask3 = x_mask.astype(jnp.int32).reshape(batch, seq, 1)   # free reshape
    weight = weight.astype(jnp.float32).reshape(1, hdim)       # keep f32 (tiny)

    x_itemsize = jnp.dtype(x.dtype).itemsize
    out_itemsize = x_itemsize

    vmem_cap = _physical_vmem_bytes()
    vmem_limit = max(32 * 1024 * 1024, (vmem_cap * 3) // 4)    # ~48 MiB v7x, ~96 MiB v5e/v6e
    budget = (vmem_limit * 4) // 5

    tb, tl, est = _tile_plan(batch, seq, hdim, x_itemsize, out_itemsize, budget)
    vmem_limit = min(vmem_cap, max(vmem_limit, est + (4 << 20)))

    nb = _cdiv(batch, tb)
    nl = _cdiv(seq, tl)
    ragged_l = (seq % tl) != 0
    # MXU scoring needs a relayout-free (tb, tl, H) -> (tb*tl, H) reshape.
    score_via_mxu = (hdim <= 256) and (tl % 8 == 0)
    w_arg = weight.reshape(hdim, 1) if score_via_mxu else weight

    kernel = functools.partial(
        _pool_kernel, l_chunk=tl, seq_len=seq,
        ragged_l=ragged_l, score_via_mxu=score_via_mxu)

    return pl.pallas_call(
        kernel,
        out_shape=jax.ShapeDtypeStruct((batch, hdim), x.dtype),
        grid_spec=pltpu.PrefetchScalarGridSpec(
            num_scalar_prefetch=0,
            grid=(nb, nl),
            in_specs=[
                pl.BlockSpec(w_arg.shape, lambda b, l: (0, 0)),       # weight
                pl.BlockSpec((tb, tl, hdim), lambda b, l: (b, l, 0)),  # x tile
                pl.BlockSpec((tb, tl, 1), lambda b, l: (b, l, 0)),     # mask tile
            ],
            out_specs=pl.BlockSpec((tb, hdim), lambda b, l: (b, 0)),
            scratch_shapes=[
                pltpu.VMEM((tb, 1), jnp.float32),     # running max
                pltpu.VMEM((tb, 1), jnp.float32),     # running denominator
                pltpu.VMEM((tb, hdim), jnp.float32),  # weighted-sum accumulator
            ],
        ),
        compiler_params=pltpu.CompilerParams(
            dimension_semantics=("parallel", "arbitrary"),
            vmem_limit_bytes=int(vmem_limit),
        ),
    )(w_arg, x, mask3)


def _reference(x, weight, x_mask):
    x32 = x.astype(jnp.float32)
    w32 = weight.astype(jnp.float32)
    scores = jnp.einsum("blh,oh->bl", x32, w32,
                        precision=jax.lax.Precision.HIGHEST)
    scores = jnp.where(x_mask != 0, -jnp.inf, scores)
    alpha = jax.nn.softmax(scores, axis=-1)
    out = jnp.einsum("bl,blh->bh", alpha, x32,
                     precision=jax.lax.Precision.HIGHEST)
    return out.astype(x.dtype)


if __name__ == "__main__":
    root = jax.random.PRNGKey(0)

    def check(batch, seq, hdim, with_mask):
        key = jax.random.fold_in(root, batch * 100000 + seq * 1000 + hdim)
        kx, kw, km = jax.random.split(key, 3)
        x = jax.random.normal(kx, (batch, seq, hdim), dtype=jnp.float32)
        weight = jax.random.normal(kw, (1, hdim), dtype=jnp.float32) / jnp.sqrt(hdim)
        if with_mask:
            mask = (jax.random.uniform(km, (batch, seq)) < 0.25).astype(jnp.int32)
            mask = mask.at[:, 0].set(0)   # keep >= 1 valid position per row
        else:
            mask = None
        out = jax.block_until_ready(linear_seq_attn_pooling(x, weight, mask))
        ref = _reference(x, weight,
                         mask if mask is not None
                         else jnp.zeros((batch, seq), jnp.int32))
        assert out.shape == (batch, hdim)
        assert jnp.allclose(out, ref, atol=1e-4, rtol=1e-4), \
            f"mismatch at B={batch} L={seq} H={hdim} mask={with_mask}"

    # spec-sized case: batch=2, len=8, hidden=32, with padding mask (MXU scores)
    check(2, 8, 32, with_mask=True)
    # ragged batch tail (B % 8 != 0, B > 8), H not a multiple of 128, no mask
    check(10, 24, 160, with_mask=False)
    # wider hidden: VPU/XLU scoring path (H > 256)
    check(4, 16, 384, with_mask=True)

    print("KERNEL_OK")
</pallas_src>

<mosaic_0001>
module attributes {stable_mosaic.version = 11 : i64} {
  func.func @_pool_kernel(%arg0: i32, %arg1: i32, %arg2: memref<32x1xf32, #tpu.memory_space<vmem>>, %arg3: memref<2x8x32xf32, #tpu.memory_space<vmem>>, %arg4: memref<2x8x1xi32, #tpu.memory_space<vmem>>, %arg5: memref<2x32xf32, #tpu.memory_space<vmem>>, %arg6: memref<2x1xf32, #tpu.memory_space<vmem>>, %arg7: memref<2x1xf32, #tpu.memory_space<vmem>>, %arg8: memref<2x32xf32, #tpu.memory_space<vmem>>) attributes {dimension_semantics = [#tpu.dimension_semantics<parallel>, #tpu.dimension_semantics<arbitrary>], iteration_bounds = array<i64: 1, 1>, scalar_prefetch = 0 : i64, scratch_operands = 3 : i64, tpu.core_type = #tpu.core_type<tc>, window_params = [{pipeline_mode = #tpu.pipeline_mode<synchronous>, transform_indices = @transform_0, window_bounds = array<i64: 32, 1>}, {transform_indices = @transform_1, window_bounds = array<i64: 2, 8, 32>}, {transform_indices = @transform_2, window_bounds = array<i64: 2, 8, 1>}, {transform_indices = @transform_3, window_bounds = array<i64: 2, 32>}]} {
    %c0_i32 = arith.constant 0 : i32
    %0 = arith.cmpi eq, %arg1, %c0_i32 : i32
    %1 = arith.extui %0 : i1 to i32
    %c0_i32_0 = arith.constant 0 : i32
    %2 = arith.cmpi ne, %1, %c0_i32_0 : i32
    scf.if %2 {
      %cst_29 = arith.constant 0xFF800000 : f32
      %43 = vector.broadcast %cst_29 : f32 to vector<2x1xf32>
      %c0_30 = arith.constant 0 : index
      %c0_31 = arith.constant 0 : index
      %44 = vector.load %arg6[%c0_30, %c0_31] : memref<2x1xf32, #tpu.memory_space<vmem>>, vector<2x1xf32>
      tpu.vector_store %arg6[%c0_30, %c0_31], %43 {strides = array<i32>} : memref<2x1xf32, #tpu.memory_space<vmem>>, vector<2x1xf32>,
      %cst_32 = arith.constant 0.000000e+00 : f32
      %45 = vector.broadcast %cst_32 : f32 to vector<2x1xf32>
      %c0_33 = arith.constant 0 : index
      %c0_34 = arith.constant 0 : index
      %46 = vector.load %arg7[%c0_33, %c0_34] : memref<2x1xf32, #tpu.memory_space<vmem>>, vector<2x1xf32>
      tpu.vector_store %arg7[%c0_33, %c0_34], %45 {strides = array<i32>} : memref<2x1xf32, #tpu.memory_space<vmem>>, vector<2x1xf32>,
      %cst_35 = arith.constant 0.000000e+00 : f32
      %47 = vector.broadcast %cst_35 : f32 to vector<2x32xf32>
      %c0_36 = arith.constant 0 : index
      %c0_37 = arith.constant 0 : index
      %48 = vector.load %arg8[%c0_36, %c0_37] : memref<2x32xf32, #tpu.memory_space<vmem>>, vector<2x32xf32>
      tpu.vector_store %arg8[%c0_36, %c0_37], %47 {strides = array<i32>} : memref<2x32xf32, #tpu.memory_space<vmem>>, vector<2x32xf32>,
    } else {
    }
    %c0 = arith.constant 0 : index
    %c0_1 = arith.constant 0 : index
    %c0_2 = arith.constant 0 : index
    %3 = vector.load %arg3[%c0, %c0_1, %c0_2] : memref<2x8x32xf32, #tpu.memory_space<vmem>>, vector<2x8x32xf32>
    %c0_3 = arith.constant 0 : index
    %c0_4 = arith.constant 0 : index
    %c0_5 = arith.constant 0 : index
    %4 = vector.load %arg4[%c0_3, %c0_4, %c0_5] : memref<2x8x1xi32, #tpu.memory_space<vmem>>, vector<2x8x1xi32>
    %c0_i32_6 = arith.constant 0 : i32
    %5 = vector.broadcast %c0_i32_6 : i32 to vector<2x8x1xi32>
    %6 = arith.cmpi ne, %4, %5 : vector<2x8x1xi32>
    %7 = vector.shape_cast %3 : vector<2x8x32xf32> to vector<16x32xf32>
    %c0_7 = arith.constant 0 : index
    %c0_8 = arith.constant 0 : index
    %8 = vector.load %arg2[%c0_7, %c0_8] : memref<32x1xf32, #tpu.memory_space<vmem>>, vector<32x1xf32>
    %cst = arith.constant dense<0.000000e+00> : vector<16x1xf32>
    %9 = tpu.matmul %7, %8, %cst {dimension_numbers = #tpu.dot_dimension_numbers<[1], [0], [0], [1], [0, 0, 1, 1], [], []>} : vector<16x32xf32>, vector<32x1xf32>, vector<16x1xf32> -> vector<16x1xf32>
    %10 = vector.shape_cast %9 : vector<16x1xf32> to vector<2x8x1xf32>
    %cst_9 = arith.constant 0xFF800000 : f32
    %11 = vector.broadcast %cst_9 : f32 to vector<2x8x1xf32>
    %12 = arith.select %6, %11, %10 : vector<2x8x1xi1>, vector<2x8x1xf32>
    %c0_10 = arith.constant 0 : index
    %c0_11 = arith.constant 0 : index
    %13 = vector.load %arg6[%c0_10, %c0_11] : memref<2x1xf32, #tpu.memory_space<vmem>>, vector<2x1xf32>
    %cst_12 = arith.constant dense<0xFF800000> : vector<2x1xf32>
    %14 = vector.multi_reduction <maximumf>, %12, %cst_12 [1] : vector<2x8x1xf32> to vector<2x1xf32>
    %15 = arith.maximumf %13, %14 : vector<2x1xf32>
    %cst_13 = arith.constant 0xFF800000 : f32
    %16 = vector.broadcast %cst_13 : f32 to vector<2x1xf32>
    %17 = arith.cmpf oeq, %15, %16 : vector<2x1xf32>
    %cst_14 = arith.constant 0.000000e+00 : f32
    %18 = vector.broadcast %cst_14 : f32 to vector<2x1xf32>
    %19 = arith.select %17, %18, %15 : vector<2x1xi1>, vector<2x1xf32>
    %20 = vector.shape_cast %19 : vector<2x1xf32> to vector<2x1x1xf32>
    %21 = vector.broadcast %20 : vector<2x1x1xf32> to vector<2x8x1xf32>
    %22 = arith.subf %12, %21 : vector<2x8x1xf32>
    %23 = math.exp %22 : vector<2x8x1xf32>
    %24 = arith.subf %13, %19 : vector<2x1xf32>
    %25 = math.exp %24 : vector<2x1xf32>
    %c0_15 = arith.constant 0 : index
    %c0_16 = arith.constant 0 : index
    %26 = vector.load %arg7[%c0_15, %c0_16] : memref<2x1xf32, #tpu.memory_space<vmem>>, vector<2x1xf32>
    %27 = arith.mulf %25, %26 : vector<2x1xf32>
    %cst_17 = arith.constant dense<0.000000e+00> : vector<2x1xf32>
    %28 = vector.multi_reduction <add>, %23, %cst_17 [1] : vector<2x8x1xf32> to vector<2x1xf32>
    %29 = arith.addf %27, %28 : vector<2x1xf32>
    %c0_18 = arith.constant 0 : index
    %c0_19 = arith.constant 0 : index
    %30 = vector.load %arg7[%c0_18, %c0_19] : memref<2x1xf32, #tpu.memory_space<vmem>>, vector<2x1xf32>
    tpu.vector_store %arg7[%c0_18, %c0_19], %29 {strides = array<i32>} : memref<2x1xf32, #tpu.memory_space<vmem>>, vector<2x1xf32>,
    %c0_20 = arith.constant 0 : index
    %c0_21 = arith.constant 0 : index
    %31 = vector.load %arg8[%c0_20, %c0_21] : memref<2x32xf32, #tpu.memory_space<vmem>>, vector<2x32xf32>
    %32 = vector.broadcast %25 : vector<2x1xf32> to vector<2x32xf32>
    %33 = arith.mulf %32, %31 : vector<2x32xf32>
    %34 = vector.broadcast %23 : vector<2x8x1xf32> to vector<2x8x32xf32>
    %35 = arith.mulf %34, %3 : vector<2x8x32xf32>
    %cst_22 = arith.constant dense<0.000000e+00> : vector<2x32xf32>
    %36 = vector.multi_reduction <add>, %35, %cst_22 [1] : vector<2x8x32xf32> to vector<2x32xf32>
    %37 = arith.addf %33, %36 : vector<2x32xf32>
    %c0_23 = arith.constant 0 : index
    %c0_24 = arith.constant 0 : index
    %38 = vector.load %arg8[%c0_23, %c0_24] : memref<2x32xf32, #tpu.memory_space<vmem>>, vector<2x32xf32>
    tpu.vector_store %arg8[%c0_23, %c0_24], %37 {strides = array<i32>} : memref<2x32xf32, #tpu.memory_space<vmem>>, vector<2x32xf32>,
    %c0_25 = arith.constant 0 : index
    %c0_26 = arith.constant 0 : index
    %39 = vector.load %arg6[%c0_25, %c0_26] : memref<2x1xf32, #tpu.memory_space<vmem>>, vector<2x1xf32>
    tpu.vector_store %arg6[%c0_25, %c0_26], %15 {strides = array<i32>} : memref<2x1xf32, #tpu.memory_space<vmem>>, vector<2x1xf32>,
    %c0_i32_27 = arith.constant 0 : i32
    %40 = arith.cmpi eq, %arg1, %c0_i32_27 : i32
    %41 = arith.extui %40 : i1 to i32
    %c0_i32_28 = arith.constant 0 : i32
    %42 = arith.cmpi ne, %41, %c0_i32_28 : i32
    scf.if %42 {
      %c0_29 = arith.constant 0 : index
      %c0_30 = arith.constant 0 : index
      %43 = vector.load %arg8[%c0_29, %c0_30] : memref<2x32xf32, #tpu.memory_space<vmem>>, vector<2x32xf32>
      %c0_31 = arith.constant 0 : index
      %c0_32 = arith.constant 0 : index
      %44 = vector.load %arg7[%c0_31, %c0_32] : memref<2x1xf32, #tpu.memory_space<vmem>>, vector<2x1xf32>
      %45 = tpu.reciprocal %44 : vector<2x1xf32> -> vector<2x1xf32>
      %46 = vector.broadcast %45 : vector<2x1xf32> to vector<2x32xf32>
      %47 = arith.mulf %43, %46 : vector<2x32xf32>
      %c0_33 = arith.constant 0 : index
      %c0_34 = arith.constant 0 : index
      %48 = vector.load %arg5[%c0_33, %c0_34] : memref<2x32xf32, #tpu.memory_space<vmem>>, vector<2x32xf32>
      tpu.vector_store %arg5[%c0_33, %c0_34], %47 {strides = array<i32>} : memref<2x32xf32, #tpu.memory_space<vmem>>, vector<2x32xf32>,
    } else {
    }
    return
  }
  func.func @transform_0(%arg0: i32, %arg1: i32) -> (i32, i32) {
    %c0_i32 = arith.constant 0 : i32
    %c0_i32_0 = arith.constant 0 : i32
    %c0_i32_1 = arith.constant 0 : i32
    return %c0_i32, %c0_i32_0 : i32, i32
  }
  func.func @transform_1(%arg0: i32, %arg1: i32) -> (i32, i32, i32) {
    %c0_i32 = arith.constant 0 : i32
    %c0_i32_0 = arith.constant 0 : i32
    return %arg0, %arg1, %c0_i32 : i32, i32, i32
  }
  func.func @transform_2(%arg0: i32, %arg1: i32) -> (i32, i32, i32) {
    %c0_i32 = arith.constant 0 : i32
    %c0_i32_0 = arith.constant 0 : i32
    return %arg0, %arg1, %c0_i32 : i32, i32, i32
  }
  func.func @transform_3(%arg0: i32, %arg1: i32) -> (i32, i32) {
    %c0_i32 = arith.constant 0 : i32
    %c0_i32_0 = arith.constant 0 : i32
    return %arg0, %c0_i32 : i32, i32
  }
}

</mosaic_0001>

<bundles_post_ra>
// kernel: linear_seq_attn_pooling.1
= control target key start
LH: loop header
LB: loop body
LE: loop exit
PB: predicated region body
PF: predicated region fallthrough
CT: control target
= control target key end

     0   :  { %s336_s0 = inlined_call_operand.vmem [shape: f32[32,1], index: 0, kind: input, shape index: {}]   ;;  %s337_s1 = inlined_call_operand.vmem [shape: f32[2,8,32], index: 1, kind: input, shape index: {}]   ;;  %s338_s2 = inlined_call_operand.vmem [shape: s32[2,8,1], index: 2, kind: input, shape index: {}]   ;;  %s339_s3 = inlined_call_operand.hbm [shape: f32[2,32], index: 3, kind: output, shape index: {}]  }
   0x1   :  { %v33_v0 = vld [vmem:[%s336_s0 + $0x18] sm:$0xff]  ;;  %v32_v1 = vld [vmem:[%s336_s0 + $0x10] sm:$0xff]  ;;  %v31_v2 = vld [vmem:[%s336_s0 + $0x8] sm:$0xff] }
   0x2   :  { %53 = vmatpush.msra.mxu0 %v33_v0  ;;  %213 = vmatpush.msra.mxu1 %v33_v0 }
   0x3   :  { %8 = vsyncpa [#allocation6], 0  ;;  %v30_v3 = vld [vmem:[%s336_s0] sm:$0xff]  ;;  %vm34_vm0 = vcmask 261120   ;;  %v301_v5 = vld [vmem:[%s337_s1 + $0x8] sm:$0xff]  ;;  %vm19_vm1 = vcmask 1024  }
   0x4   :  { %54 = vmatpush.msra.mxu0 %v32_v1  ;;  %214 = vmatpush.msra.mxu1 %v32_v1  ;;  %v296_v4 = vld [vmem:[%s337_s1] sm:$0xff]  ;;  %v257_v6 = vmov -inf   ;;  %v258_v7 = vmov 0.0   ;;  %v27_v9 = vld [vmem:[%s338_s2 + $0x8] sm:$0xff]  ;;  %v259_v10 = vmov 0   ;;  %vm67_vm4 = vcmask 7168  }
   0x5   :  { %20 = vst.msk [vmem:[#allocation2] sm:$0x3] %vm19_vm1, %v257_v6  ;;  %v26_v8 = vld [vmem:[%s338_s2] sm:$0xff]  ;;  %vm29_vm3 = vcmp.ne.s32.totalorder %v27_v9, 0  ;;  %222 = vset.pattern.permute.xlu1 %v259_v10  ;;  %221 = vset.pattern.permute.xlu0 %v259_v10  ;;  %vm84_vm5 = vcmask 1041409   ;;  %vm22_vm7 = vcmask 254976  }
   0x6   :  { %55 = vmatpush.msra.mxu0 %v31_v2  ;;  %215 = vmatpush.msra.mxu1 %v31_v2  ;;  %21 = vst.msk [vmem:[#allocation3] sm:$0x3] %vm19_vm1, %v258_v7  ;;  %vm28_vm2 = vcmp.ne.s32.totalorder %v26_v8, 0  ;;  %s260_s2 = smov [#allocation5]   ;;  %s202_s29 = sshll.u32 %s339_s3, 4  ;;  %s203_s29 = int_to_ptr.hbm [resolvable:$true] %s202_s29 }
   0x7   :  { %23 = vst.msk [vmem:[#allocation4] sm:$0x3] %vm22_vm7, %v258_v7  ;;  %s200_s26 = sshll.u32 %s260_s2, 4  ;;  %s201_s26 = int_to_ptr.vmem [resolvable:$true] %s200_s26 }
   0x8   :  { %56 = vmatpush.msra.mxu0 %v30_v3  ;;  %216 = vmatpush.msra.mxu1 %v30_v3 }
   0x9   :  { %211 = vmatmul.msk.f32.vlgmr.msra.gmra.mxu0 %vm34_vm0, %v296_v4  ;;  %212 = vmatmul.msk.f32.vlgmr.msra.gmra.mxu1 %vm34_vm0, %v301_v5 }
   0xc   :  { %v66_v28 = vld [vmem:[#allocation2] sm:$0x3] }
   0xd   :  { %v105_v57 = vld [vmem:[#allocation3] sm:$0x3] }
  0x86   :  { %v58_v11 = vpop.f32.mrf.mxu0  ;;  %v61_v12 = vpop.f32.mrf.mxu1 }
  0x87   :  { %v64_v13 = vsel %vm28_vm2, -inf, %v58_v11  ;;  %v65_v14 = vsel %vm29_vm3, -inf, %v61_v12 }
  0x88   :  { %v68_v15 = vsel %vm67_vm4, %v64_v13, -inf  ;;  %v75_v16 = vsel %vm67_vm4, %v65_v14, -inf }
  0x89   :  { %v69_v17 = vrot.slane %v68_v15, 4  ;;  %v76_v18 = vrot.slane %v75_v16, 4 }
  0x8b   :  { %v70_v19 = vmax.f32 %v68_v15, %v69_v17  ;;  %v77_v20 = vmax.f32 %v75_v16, %v76_v18 }
  0x8d   :  { %v71_v21 = vrot.slane %v70_v19, 2  ;;  %v78_v22 = vrot.slane %v77_v20, 2 }
  0x8f   :  { %v72_v23 = vmax.f32 %v70_v19, %v71_v21  ;;  %v79_v24 = vmax.f32 %v77_v20, %v78_v22 }
  0x91   :  { %v73_v25 = vrot.slane %v72_v23, 1  ;;  %v80_v26 = vrot.slane %v79_v24, 1 }
  0x93   :  { %v74_v27 = vmax.f32 %v72_v23, %v73_v25  ;;  %v81_v29 = vmax.f32 %v79_v24, %v80_v26 }
  0x95   :  { %v85_v30 = vsel %vm84_vm5, %v81_v29, %v74_v27  ;;  %v128_v27 = vld [vmem:[#allocation4] sm:$0x3] }
  0x96   :  { %v87_v31 = vmax.f32 %v66_v28, %v85_v30 }
  0x98   :  { %vm88_vm6 = vcmp.eq.f32.partialorder %v87_v31, -inf  ;;  %168 = vst.msk [vmem:[#allocation2] sm:$0x3] %vm19_vm1, %v87_v31 }
  0x99   :  { %v89_v32 = vsel %vm88_vm6, 0.0, %v87_v31 }
  0x9a   :  { %v91_v33 = vrot.slane %v89_v32, 1  ;;  %v92_v34 = vperm.slane %v89_v32, 0  ;;  %v102_v35 = vsub.f32 %v66_v28, %v89_v32 }
  0x9c   :  { %v93_v36 = vperm.slane %v91_v33, 0  ;;  %v103_v37 = vmul.f32 1.442695, %v102_v35  ;;  %v96_v38 = vsub.f32 %v64_v13, %v92_v34 }
  0x9e   :  { %v97_v39 = vsub.f32 %v65_v14, %v93_v36  ;;  %223 = vpow2.f32 %v103_v37  ;;  %v98_v40 = vmul.f32 1.442695, %v96_v38 }
  0xa0   :  { %v100_v41 = vmul.f32 1.442695, %v97_v39  ;;  %225 = vpow2.f32 %v98_v40 }
  0xa2   :  { %227 = vpow2.f32 %v100_v41 }
  0xa4   :  { %v224_v42 = vpop.eup %223 }
  0xa5   :  { %131 = vperm.xlu1 %222, %v224_v42   ;;  %v106_v60 = vmul.f32 %v224_v42, %v105_v57 }
  0xa6   :  { %v226_v43 = vpop.eup %225 }
  0xa7   :  { %137 = vperm.xlu0 %221, %v226_v43   ;;  %v107_v44 = vsel %vm67_vm4, %v226_v43, 0.0 }
  0xa8   :  { %v228_v45 = vpop.eup %227  ;;  %v108_v46 = vrot.slane %v107_v44, 4 }
  0xa9   :  { %v114_v47 = vsel %vm67_vm4, %v228_v45, 0.0 }
  0xaa   :  { %v115_v48 = vrot.slane %v114_v47, 4  ;;  %v109_v49 = vadd.f32 %v108_v46, %v107_v44 }
  0xac   :  { %v116_v50 = vadd.f32 %v115_v48, %v114_v47  ;;  %v110_v51 = vrot.slane %v109_v49, 2 }
  0xae   :  { %v117_v52 = vrot.slane %v116_v50, 2  ;;  %v111_v53 = vadd.f32 %v110_v51, %v109_v49 }
  0xaf   :  { %142 = vperm.xlu0 %221, %v228_v45  }
  0xb0   :  { %v118_v54 = vadd.f32 %v117_v52, %v116_v50  ;;  %v112_v55 = vrot.slane %v111_v53, 1 }
  0xb2   :  { %v119_v56 = vrot.slane %v118_v54, 1  ;;  %v113_v59 = vadd.f32 %v112_v55, %v111_v53 }
  0xb4   :  { %v120_v58 = vadd.f32 %v119_v56, %v118_v54 }
  0xb6   :  { %v123_v61 = vsel %vm84_vm5, %v120_v58, %v113_v59 }
  0xb7   :  { %v125_v62 = vadd.f32 %v123_v61, %v106_v60 }
  0xb9   :  { %127 = vst.msk [vmem:[#allocation3] sm:$0x3] %vm19_vm1, %v125_v62 }
  0xc0   :  { %v173_v63 = vld [vmem:[#allocation3] sm:$0x3] }
  0xc1   :  { %229 = vrcp.f32 %v173_v63  ;;  %v185_v3 = vand.u32 2147483648, %v173_v63  ;;  %v183_v8 = vand.u32 2147483647, %v173_v63  ;;  %vm179_vm9 = vweird.f32 %v173_v63 }
  0xc3   :  { %v186_v7 = vor.u32 1.1754944e-38, %v185_v3  ;;  %vm184_vm11 = vcmp.eq.f32.partialorder %v183_v8, 8.507059e+37 }
  0xc7   :  { %v230_v0 = vpop.eup %229 }
  0xc8   :  { %v175_v1 = vmul.f32 %v230_v0, %v173_v63  ;;  %vm180_vm8 = vweird.f32 %v230_v0 }
  0xc9   :  { %vm181_vm10 = vmor %vm179_vm9, %vm180_vm8 }
  0xca   :  { %v176_v2 = vsub.f32 1.0, %v175_v1 }
  0xcc   :  { %v177_v6 = vmul.f32 %v230_v0, %v176_v2 }
  0xce   :  { %v178_v9 = vadd.f32 %v230_v0, %v177_v6 }
  0xd0   :  { %v182_v10 = vsel %vm181_vm10, %v230_v0, %v178_v9 }
  0xd1   :  { %v187_v11 = vsel %vm184_vm11, %v186_v7, %v182_v10 }
  0xd2   :  { %190 = vperm.xlu1 %222, %v187_v11  }
 0x117   :  { %v132_v28 = vpop.permute.xlu1 %131 }
 0x118   :  { %v134_v31 = vmul.f32 %v132_v28, %v128_v27 }
 0x119   :  { %v138_v12 = vpop.permute.xlu0 %137 }
 0x11a   :  { %v145_v13 = vmul.f32 %v138_v12, %v296_v4 }
 0x11c   :  { %v147_v14 = vsel %vm34_vm0, %v145_v13, 0.0 }
 0x11d   :  { %v148_v15 = vrot.slane %v147_v14, 4 }
 0x11f   :  { %v149_v16 = vadd.f32 %v148_v15, %v147_v14 }
 0x121   :  { %v143_v17 = vpop.permute.xlu0 %142  ;;  %v150_v19 = vrot.slane %v149_v16, 2 }
 0x122   :  { %v146_v18 = vmul.f32 %v143_v17, %v301_v5 }
 0x123   :  { %v151_v22 = vadd.f32 %v150_v19, %v149_v16 }
 0x124   :  { %v154_v20 = vsel %vm34_vm0, %v146_v18, 0.0 }
 0x125   :  { %v155_v21 = vrot.slane %v154_v20, 4  ;;  %v152_v25 = vrot.slane %v151_v22, 1 }
 0x127   :  { %v156_v23 = vadd.f32 %v155_v21, %v154_v20  ;;  %v153_v4 = vadd.f32 %v152_v25, %v151_v22 }
 0x129   :  { %v157_v24 = vrot.slane %v156_v23, 2 }
 0x12b   :  { %v158_v26 = vadd.f32 %v157_v24, %v156_v23 }
 0x12d   :  { %v159_v29 = vrot.slane %v158_v26, 1 }
 0x12f   :  { %v160_v30 = vadd.f32 %v159_v29, %v158_v26 }
 0x131   :  { %v163_v32 = vsel %vm84_vm5, %v160_v30, %v153_v4 }
 0x132   :  { %v165_v33 = vadd.f32 %v163_v32, %v134_v31 }
 0x134   :  { %167 = vst.msk [vmem:[#allocation4] sm:$0x3] %vm22_vm7, %v165_v33 }
 0x13b   :  { %v172_v5 = vld [vmem:[#allocation4] sm:$0x3] }
 0x144   :  { %v191_v34 = vpop.permute.xlu1 %190 }
 0x145   :  { %v193_v35 = vmul.f32 %v191_v34, %v172_v5 }
 0x147   :  { %194 = vst.msk [vmem:[#allocation5] sm:$0x3] %vm22_vm7, %v193_v35 }
 0x148   :  { %205 = dma.vmem_to_hbm [thread:$0]  %s201_s26, 32, %s203_s29, [#allocation6]  }
 0x149   :  { %255 = dma.done.wait [#allocation6], 32  }
 0x14a   :  { %256 = vsyncadd [#allocation6], 4294967264 }
 0x14b   :  { %210 = vsyncpa [#allocation6], 1 }

</bundles_post_ra>
